<compile_context>
chip_gen: v6e
topology: v6e:2x2x1
jax: 0.10.0
libtpu: 0.0.40
codegen_flags: <defaults>
</compile_context>

<pallas_src>
import jax
import jax.numpy as jnp
import numpy as np
from jax.experimental import pallas as pl
from jax.experimental.pallas import tpu as pltpu

_BN_EPS = 1e-5


def _vmem_budget():
    """(vmem_limit_bytes, per-step working-set budget), gated on the chip generation."""
    try:
        cap = int(pltpu.get_tpu_info().vmem_capacity_bytes)
    except Exception:
        cap = 64 << 20                       # conservative fallback: v7x-sized VMEM
    limit = int(min(0.6 * cap, 96 << 20))    # ~38 MiB on v7x, ~76 MiB on v5e/v6e
    budget = int(0.6 * limit)                # headroom for pallas-internal scratch
    return limit, budget


def _pick_stats_tile(nc, hw, budget_bytes):
    """Largest divisor of `nc` whose double-buffered (t, hw) input block fits the
    budget and satisfies the sublane rule (t % 8 == 0 or t == nc)."""
    limit = max(1, budget_bytes // (2 * hw * 4))
    fallback = nc                            # t == nc is always legal (full extent)
    for t in range(nc, 0, -1):
        if nc % t or not (t % 8 == 0 or t == nc):
            continue
        if t <= limit:
            return t
    # No legal divisor fits the budget -> full array (legal, may exceed the soft
    # budget).  TODO(synk): also tile the spatial/lane axis for this case.
    return fallback


def _pick_pooled_row_tile(n, hp, wp, w, c, cout, budget_bytes):
    """Pooled-row tile `thp`: a divisor of hp with (thp*wp) % 128 == 0 (legal,
    lane-dense sub-tile) or thp == hp (full image).  Preference order: fits the
    double-buffered in+out+pool-matrix budget, modest pooling-matrix size
    (Mt <= 512), >= 4 total grid steps (megacore / pipelining), then largest."""
    def bytes_needed(thp):
        st, mt = 2 * thp * w, thp * wp
        return 4 * (2 * st * c + 2 * mt * cout + 2 * st * mt + cout * c + 2 * c + cout)

    cands = [t for t in range(1, hp + 1)
             if hp % t == 0 and (t == hp or (t * wp) % 128 == 0)]
    pool = [t for t in cands if bytes_needed(t) <= budget_bytes] or [min(cands)]
    modest = [t for t in pool if t * wp <= 512] or pool
    steps = [t for t in modest if n * (hp // t) >= 4] or modest
    return max(steps)


def _bn_stats_kernel(x_ref, sum_ref, sq_ref):
    """Per-(n, c) row partial sum / sum-of-squares over the spatial (lane) axis.
    Each grid step owns its own output rows -> the grid axis is fully parallel."""
    x = x_ref[...].astype(jnp.float32)                     # (TR, H*W)
    sum_ref[...] = jnp.sum(x, axis=1, keepdims=True)       # (TR, 1)
    sq_ref[...] = jnp.sum(x * x, axis=1, keepdims=True)    # (TR, 1)


def _apply_kernel(x_ref, scale_ref, shift_ref, w_ref, b_ref, pool_ref, o_ref):
    """Folded BN -> ReLU -> 2x2 avg pool (via constant pooling matrix on the MXU)
    -> 1x1 conv, channel-major: NCHW block in, NCHW block out."""
    x = x_ref[0].astype(jnp.float32)                       # (C, St)   St = 2*thp*W
    # BatchNorm folded to per-channel scale/shift (lane broadcast), then ReLU.
    y = jnp.maximum(x * scale_ref[...] + shift_ref[...], 0.0)
    # Both halves of the 2x2 average pool in one matmul; the 0.25 scale is folded
    # into the pooling matrix.  Result is already (C, Mt), the conv-RHS layout.
    q = jnp.dot(y, pool_ref[...], preferred_element_type=jnp.float32)   # (C, Mt)
    # 1x1 conv as a channel contraction; output is channel-major -> direct NCHW store.
    z = jnp.dot(w_ref[...], q, preferred_element_type=jnp.float32)      # (Cout, Mt)
    o_ref[0] = (z + b_ref[...]).astype(o_ref.dtype)


def transition_layer_forward(x_nchw, gamma, beta, conv_w, conv_b):
    """x_nchw: (N, C, H, W) float32; returns (N, Cout, H//2, W//2) (PyTorch semantics)."""
    N, C, H, W = x_nchw.shape
    assert H % 2 == 0 and W % 2 == 0, "AvgPool2d(2,2) path assumes even H, W"
    Cout = conv_w.shape[0]
    Hp, Wp = H // 2, W // 2
    HW, NC, Mfull = H * W, N * C, (H // 2) * (W // 2)

    vmem_limit, budget = _vmem_budget()

    # ---------- pass 1: per-(n,c) spatial sums on the raw NCHW buffer ----------
    x_rows = x_nchw.reshape(NC, HW)                        # free (contiguous) view
    ts = _pick_stats_tile(NC, HW, budget)
    row_sum, row_sq = pl.pallas_call(
        _bn_stats_kernel,
        out_shape=(jax.ShapeDtypeStruct((NC, 1), jnp.float32),
                   jax.ShapeDtypeStruct((NC, 1), jnp.float32)),
        grid=(NC // ts,),
        in_specs=[pl.BlockSpec((ts, HW), lambda i: (i, 0))],
        out_specs=[pl.BlockSpec((ts, 1), lambda i: (i, 0)),
                   pl.BlockSpec((ts, 1), lambda i: (i, 0))],
        compiler_params=pltpu.CompilerParams(
            dimension_semantics=("parallel",),
            vmem_limit_bytes=vmem_limit),
    )(x_rows)

    # Tiny per-channel finish in the wrapper (O(N*C) work).
    cnt = jnp.float32(N * HW)
    mean = row_sum.reshape(N, C).sum(axis=0) / cnt
    var = jnp.maximum(row_sq.reshape(N, C).sum(axis=0) / cnt - mean * mean, 0.0)
    scale = gamma.astype(jnp.float32) * jax.lax.rsqrt(var + _BN_EPS)
    shift = beta.astype(jnp.float32) - mean * scale
    scale2d = scale[:, None]                               # (C, 1)
    shift2d = shift[:, None]                               # (C, 1)

    # 1x1-conv weights channel-major; bias as a column for lane broadcast.
    w_mat = conv_w.reshape(Cout, C).astype(jnp.float32)    # (Cout, C)
    b_col = conv_b.astype(jnp.float32)[:, None]            # (Cout, 1)

    # Constant pooling matrix for one tile: maps (2*thp, W) pixels -> (thp, Wp)
    # pooled pixels, entries 0.25 (average folded in).  Built at trace time.
    thp = _pick_pooled_row_tile(N, Hp, Wp, W, C, Cout, budget)
    St, Mt = 2 * thp * W, thp * Wp
    s = np.arange(St)
    m_of_s = (s // W // 2) * Wp + (s % W) // 2
    pool_np = np.zeros((St, Mt), np.float32)
    pool_np[s, m_of_s] = 0.25
    pool_mat = jnp.asarray(pool_np)

    # ---------- pass 2: BN -> ReLU -> pool -> 1x1 conv, NCHW in / NCHW out ----------
    x_flat = x_nchw.reshape(N, C, HW)                      # free view
    out_flat = pl.pallas_call(
        _apply_kernel,
        out_shape=jax.ShapeDtypeStruct((N, Cout, Mfull), x_nchw.dtype),
        grid=(N, Hp // thp),
        in_specs=[
            pl.BlockSpec((1, C, St), lambda n, t: (n, 0, t)),
            pl.BlockSpec((C, 1), lambda n, t: (0, 0)),
            pl.BlockSpec((C, 1), lambda n, t: (0, 0)),
            pl.BlockSpec((Cout, C), lambda n, t: (0, 0)),
            pl.BlockSpec((Cout, 1), lambda n, t: (0, 0)),
            pl.BlockSpec((St, Mt), lambda n, t: (0, 0)),
        ],
        out_specs=pl.BlockSpec((1, Cout, Mt), lambda n, t: (n, 0, t)),
        compiler_params=pltpu.CompilerParams(
            dimension_semantics=("parallel", "parallel"),
            vmem_limit_bytes=vmem_limit),
    )(x_flat, scale2d, shift2d, w_mat, b_col, pool_mat)

    return out_flat.reshape(N, Cout, Hp, Wp)               # free view back to NCHW


def _reference(x, gamma, beta, conv_w, conv_b):
    """Pure-JAX NCHW reference mirroring the PyTorch forward."""
    mean = jnp.mean(x, axis=(0, 2, 3), keepdims=True)
    var = jnp.mean(jnp.square(x - mean), axis=(0, 2, 3), keepdims=True)
    y = (x - mean) / jnp.sqrt(var + _BN_EPS)
    y = y * gamma[None, :, None, None] + beta[None, :, None, None]
    y = jnp.maximum(y, 0.0)
    w2d = conv_w.reshape(conv_w.shape[0], -1)
    z = jnp.einsum('nchw,oc->nohw', y, w2d) + conv_b[None, :, None, None]
    N, Co, H, W = z.shape
    return z.reshape(N, Co, H // 2, 2, W // 2, 2).mean(axis=(3, 5))


if __name__ == "__main__":
    # Module config: i = 4 channels, compression = 0.5 -> Cout = 2.
    N, C, H, W = 2, 4, 16, 16
    compression = 0.5
    Cout = int(C * compression)

    key = jax.random.PRNGKey(0)
    kx, kw, kb = jax.random.split(key, 3)

    x = jax.random.normal(kx, (N, C, H, W), dtype=jnp.float32)
    # BatchNorm2d default init: weight = 1, bias = 0.  (Running-stats side-effect of
    # training-mode BN is not modeled; it does not affect the forward output.)
    gamma = jnp.ones((C,), dtype=jnp.float32)
    beta = jnp.zeros((C,), dtype=jnp.float32)
    # Conv2d(C, Cout, 1) parameters, deterministic synthetic init.
    conv_w = 0.1 * jax.random.normal(kw, (Cout, C, 1, 1), dtype=jnp.float32)
    conv_b = 0.1 * jax.random.normal(kb, (Cout,), dtype=jnp.float32)

    fwd = jax.jit(transition_layer_forward)
    out = jax.block_until_ready(fwd(x, gamma, beta, conv_w, conv_b))

    ref = jax.block_until_ready(_reference(x, gamma, beta, conv_w, conv_b))
    assert out.shape == (N, Cout, H // 2, W // 2), out.shape
    np.testing.assert_allclose(np.asarray(out), np.asarray(ref),
                               rtol=1e-4, atol=1e-4)
    print("KERNEL_OK")
</pallas_src>

<mosaic_0001>
module attributes {stable_mosaic.version = 11 : i64} {
  func.func @_bn_stats_kernel(%arg0: i32, %arg1: memref<8x256xf32, #tpu.memory_space<vmem>>, %arg2: memref<8x1xf32, #tpu.memory_space<vmem>>, %arg3: memref<8x1xf32, #tpu.memory_space<vmem>>) attributes {dimension_semantics = [#tpu.dimension_semantics<parallel>], iteration_bounds = array<i64: 1>, scalar_prefetch = 0 : i64, scratch_operands = 0 : i64, tpu.core_type = #tpu.core_type<tc>, window_params = [{transform_indices = @transform_0, window_bounds = array<i64: 8, 256>}, {transform_indices = @transform_1, window_bounds = array<i64: 8, 1>}, {transform_indices = @transform_2, window_bounds = array<i64: 8, 1>}]} {
    %c0 = arith.constant 0 : index
    %c0_0 = arith.constant 0 : index
    %0 = vector.load %arg1[%c0, %c0_0] : memref<8x256xf32, #tpu.memory_space<vmem>>, vector<8x256xf32>
    %cst = arith.constant dense<0.000000e+00> : vector<8xf32>
    %1 = vector.multi_reduction <add>, %0, %cst [1] : vector<8x256xf32> to vector<8xf32>
    %2 = vector.shape_cast %1 : vector<8xf32> to vector<8x1xf32>
    %c0_1 = arith.constant 0 : index
    %c0_2 = arith.constant 0 : index
    %3 = vector.load %arg2[%c0_1, %c0_2] : memref<8x1xf32, #tpu.memory_space<vmem>>, vector<8x1xf32>
    tpu.vector_store %arg2[%c0_1, %c0_2], %2 {strides = array<i32>} : memref<8x1xf32, #tpu.memory_space<vmem>>, vector<8x1xf32>,
    %4 = arith.mulf %0, %0 : vector<8x256xf32>
    %cst_3 = arith.constant dense<0.000000e+00> : vector<8xf32>
    %5 = vector.multi_reduction <add>, %4, %cst_3 [1] : vector<8x256xf32> to vector<8xf32>
    %6 = vector.shape_cast %5 : vector<8xf32> to vector<8x1xf32>
    %c0_4 = arith.constant 0 : index
    %c0_5 = arith.constant 0 : index
    %7 = vector.load %arg3[%c0_4, %c0_5] : memref<8x1xf32, #tpu.memory_space<vmem>>, vector<8x1xf32>
    tpu.vector_store %arg3[%c0_4, %c0_5], %6 {strides = array<i32>} : memref<8x1xf32, #tpu.memory_space<vmem>>, vector<8x1xf32>,
    return
  }
  func.func @transform_0(%arg0: i32) -> (i32, i32) {
    %c0_i32 = arith.constant 0 : i32
    %c0_i32_0 = arith.constant 0 : i32
    return %arg0, %c0_i32 : i32, i32
  }
  func.func @transform_1(%arg0: i32) -> (i32, i32) {
    %c0_i32 = arith.constant 0 : i32
    %c0_i32_0 = arith.constant 0 : i32
    return %arg0, %c0_i32 : i32, i32
  }
  func.func @transform_2(%arg0: i32) -> (i32, i32) {
    %c0_i32 = arith.constant 0 : i32
    %c0_i32_0 = arith.constant 0 : i32
    return %arg0, %c0_i32 : i32, i32
  }
}

module attributes {stable_mosaic.version = 11 : i64} {
  func.func @_apply_kernel(%arg0: i32, %arg1: i32, %arg2: memref<1x4x256xf32, #tpu.memory_space<vmem>>, %arg3: memref<4x1xf32, #tpu.memory_space<vmem>>, %arg4: memref<4x1xf32, #tpu.memory_space<vmem>>, %arg5: memref<2x4xf32, #tpu.memory_space<vmem>>, %arg6: memref<2x1xf32, #tpu.memory_space<vmem>>, %arg7: memref<256x64xf32, #tpu.memory_space<vmem>>, %arg8: memref<1x2x64xf32, #tpu.memory_space<vmem>>) attributes {dimension_semantics = [#tpu.dimension_semantics<parallel>, #tpu.dimension_semantics<parallel>], iteration_bounds = array<i64: 2, 1>, scalar_prefetch = 0 : i64, scratch_operands = 0 : i64, tpu.core_type = #tpu.core_type<tc>, window_params = [{transform_indices = @transform_0, window_bounds = array<i64: 1, 4, 256>}, {pipeline_mode = #tpu.pipeline_mode<synchronous>, transform_indices = @transform_1, window_bounds = array<i64: 4, 1>}, {pipeline_mode = #tpu.pipeline_mode<synchronous>, transform_indices = @transform_2, window_bounds = array<i64: 4, 1>}, {pipeline_mode = #tpu.pipeline_mode<synchronous>, transform_indices = @transform_3, window_bounds = array<i64: 2, 4>}, {pipeline_mode = #tpu.pipeline_mode<synchronous>, transform_indices = @transform_4, window_bounds = array<i64: 2, 1>}, {pipeline_mode = #tpu.pipeline_mode<synchronous>, transform_indices = @transform_5, window_bounds = array<i64: 256, 64>}, {transform_indices = @transform_6, window_bounds = array<i64: 1, 2, 64>}]} {
    %c0 = arith.constant 0 : index
    %c0_0 = arith.constant 0 : index
    %c0_1 = arith.constant 0 : index
    %0 = vector.load %arg2[%c0, %c0_0, %c0_1] : memref<1x4x256xf32, #tpu.memory_space<vmem>>, vector<1x4x256xf32>
    %1 = vector.shape_cast %0 : vector<1x4x256xf32> to vector<4x256xf32>
    %c0_2 = arith.constant 0 : index
    %c0_3 = arith.constant 0 : index
    %2 = vector.load %arg3[%c0_2, %c0_3] : memref<4x1xf32, #tpu.memory_space<vmem>>, vector<4x1xf32>
    %3 = vector.broadcast %2 : vector<4x1xf32> to vector<4x256xf32>
    %4 = arith.mulf %1, %3 : vector<4x256xf32>
    %c0_4 = arith.constant 0 : index
    %c0_5 = arith.constant 0 : index
    %5 = vector.load %arg4[%c0_4, %c0_5] : memref<4x1xf32, #tpu.memory_space<vmem>>, vector<4x1xf32>
    %6 = vector.broadcast %5 : vector<4x1xf32> to vector<4x256xf32>
    %7 = arith.addf %4, %6 : vector<4x256xf32>
    %cst = arith.constant 0.000000e+00 : f32
    %8 = vector.broadcast %cst : f32 to vector<4x256xf32>
    %9 = arith.maximumf %7, %8 : vector<4x256xf32>
    %c0_6 = arith.constant 0 : index
    %c0_7 = arith.constant 0 : index
    %10 = vector.load %arg7[%c0_6, %c0_7] : memref<256x64xf32, #tpu.memory_space<vmem>>, vector<256x64xf32>
    %cst_8 = arith.constant dense<0.000000e+00> : vector<4x64xf32>
    %11 = tpu.matmul %9, %10, %cst_8 {dimension_numbers = #tpu.dot_dimension_numbers<[1], [0], [0], [1], [0, 0, 1, 1], [], []>} : vector<4x256xf32>, vector<256x64xf32>, vector<4x64xf32> -> vector<4x64xf32>
    %c0_9 = arith.constant 0 : index
    %c0_10 = arith.constant 0 : index
    %12 = vector.load %arg5[%c0_9, %c0_10] : memref<2x4xf32, #tpu.memory_space<vmem>>, vector<2x4xf32>
    %cst_11 = arith.constant dense<0.000000e+00> : vector<2x64xf32>
    %13 = tpu.matmul %12, %11, %cst_11 {dimension_numbers = #tpu.dot_dimension_numbers<[1], [0], [0], [1], [0, 0, 1, 1], [], []>} : vector<2x4xf32>, vector<4x64xf32>, vector<2x64xf32> -> vector<2x64xf32>
    %c0_12 = arith.constant 0 : index
    %c0_13 = arith.constant 0 : index
    %14 = vector.load %arg6[%c0_12, %c0_13] : memref<2x1xf32, #tpu.memory_space<vmem>>, vector<2x1xf32>
    %15 = vector.broadcast %14 : vector<2x1xf32> to vector<2x64xf32>
    %16 = arith.addf %13, %15 : vector<2x64xf32>
    %c0_14 = arith.constant 0 : index
    %c0_15 = arith.constant 0 : index
    %c0_16 = arith.constant 0 : index
    %17 = vector.load %arg8[%c0_14, %c0_15, %c0_16] : memref<1x2x64xf32, #tpu.memory_space<vmem>>, vector<1x2x64xf32>
    %18 = vector.shape_cast %17 : vector<1x2x64xf32> to vector<2x64xf32>
    %19 = vector.shape_cast %16 : vector<2x64xf32> to vector<1x2x64xf32>
    tpu.vector_store %arg8[%c0_14, %c0_15, %c0_16], %19 {strides = array<i32>} : memref<1x2x64xf32, #tpu.memory_space<vmem>>, vector<1x2x64xf32>,
    return
  }
  func.func @transform_0(%arg0: i32, %arg1: i32) -> (i32, i32, i32) {
    %c0_i32 = arith.constant 0 : i32
    %c0_i32_0 = arith.constant 0 : i32
    return %arg0, %c0_i32, %arg1 : i32, i32, i32
  }
  func.func @transform_1(%arg0: i32, %arg1: i32) -> (i32, i32) {
    %c0_i32 = arith.constant 0 : i32
    %c0_i32_0 = arith.constant 0 : i32
    %c0_i32_1 = arith.constant 0 : i32
    return %c0_i32, %c0_i32_0 : i32, i32
  }
  func.func @transform_2(%arg0: i32, %arg1: i32) -> (i32, i32) {
    %c0_i32 = arith.constant 0 : i32
    %c0_i32_0 = arith.constant 0 : i32
    %c0_i32_1 = arith.constant 0 : i32
    return %c0_i32, %c0_i32_0 : i32, i32
  }
  func.func @transform_3(%arg0: i32, %arg1: i32) -> (i32, i32) {
    %c0_i32 = arith.constant 0 : i32
    %c0_i32_0 = arith.constant 0 : i32
    %c0_i32_1 = arith.constant 0 : i32
    return %c0_i32, %c0_i32_0 : i32, i32
  }
  func.func @transform_4(%arg0: i32, %arg1: i32) -> (i32, i32) {
    %c0_i32 = arith.constant 0 : i32
    %c0_i32_0 = arith.constant 0 : i32
    %c0_i32_1 = arith.constant 0 : i32
    return %c0_i32, %c0_i32_0 : i32, i32
  }
  func.func @transform_5(%arg0: i32, %arg1: i32) -> (i32, i32) {
    %c0_i32 = arith.constant 0 : i32
    %c0_i32_0 = arith.constant 0 : i32
    %c0_i32_1 = arith.constant 0 : i32
    return %c0_i32, %c0_i32_0 : i32, i32
  }
  func.func @transform_6(%arg0: i32, %arg1: i32) -> (i32, i32, i32) {
    %c0_i32 = arith.constant 0 : i32
    %c0_i32_0 = arith.constant 0 : i32
    return %arg0, %c0_i32, %arg1 : i32, i32, i32
  }
}

</mosaic_0001>

<bundles_post_ra>
// kernel: transition_layer_forward.2
= control target key start
LH: loop header
LB: loop body
LE: loop exit
PB: predicated region body
PF: predicated region fallthrough
CT: control target
= control target key end

     0   :  { %vm15_vm0 = vcmask 7168   ;;  %s58_s0 = inlined_call_operand.vmem [shape: f32[8,256], index: 0, kind: input, shape index: {}]   ;;  %s59_s1 = inlined_call_operand.vmem [shape: f32[8,1], index: 1, kind: output, shape index: {0}]   ;;  %s60_s2 = inlined_call_operand.vmem [shape: f32[8,1], index: 2, kind: output, shape index: {1}]  }
   0x1   :  { %v10_v0 = vld [vmem:[%s58_s0] sm:$0xff]  ;;  %v11_v1 = vld [vmem:[%s58_s0 + $0x8] sm:$0xff] }
   0x2   :  { %v12_v2 = vadd.f32 %v11_v1, %v10_v0  ;;  %v17_v3 = vmul.f32 %v10_v0, %v10_v0  ;;  %v18_v4 = vmul.f32 %v11_v1, %v11_v1 }
   0x4   :  { %13 = vadd.xlane.f32.xlu0 %v12_v2  ;;  %v19_v5 = vadd.f32 %v18_v4, %v17_v3 }
   0x8   :  { %20 = vadd.xlane.f32.xlu0 %v19_v5 }
  0x8d   :  { %v14_v6 = vpop.xlane.xlu0 %13 }
  0x8e   :  { %16 = vst.msk [vmem:[%s59_s1] sm:$0xff] %vm15_vm0, %v14_v6 }
  0x91   :  { %v21_v7 = vpop.xlane.xlu0 %20 }
  0x92   :  { %22 = vst.msk [vmem:[%s60_s2] sm:$0xff] %vm15_vm0, %v21_v7 }

// kernel: transition_layer_forward.3
= control target key start
LH: loop header
LB: loop body
LE: loop exit
PB: predicated region body
PF: predicated region fallthrough
CT: control target
= control target key end

     0   :  { %11 = vsyncpa [#allocation3], 0  ;;  %s809_s21 = smov 0   ;;  %s811_s22 = smov 0   ;;  %s884_s0 = inlined_call_operand.vmem [shape: f32[2,4,256], index: 0, kind: input, shape index: {}]   ;;  %s885_s1 = inlined_call_operand.vmem [shape: f32[4,1], index: 1, kind: input, shape index: {}]   ;;  %s886_s2 = inlined_call_operand.vmem [shape: f32[4,1], index: 2, kind: input, shape index: {}]   ;;  %s887_s3 = inlined_call_operand.vmem [shape: f32[2,4], index: 3, kind: input, shape index: {}]   ;;  %s888_s4 = inlined_call_operand.vmem [shape: f32[2,1], index: 4, kind: input, shape index: {}]   ;;  %s889_s5 = inlined_call_operand.hbm [shape: f32[256,64], index: 5, kind: input, shape index: {}]   ;;  %s890_s6 = inlined_call_operand.vmem [shape: f32[2,2,64], index: 6, kind: output, shape index: {}]  }
   0x1   :  { %s813_s23 = smov 0  }
   0x2 LB: > { %s613_s24 = sadd.s32 4294967295, %s765_s23   ;;  %s29_s25 = sadd.s32 1, %s761_s22  ;;  %s765_s23 = sphi %s813_s23, %s17_s23   ;;  %s761_s22 = sphi %s811_s22, %s894_s22   ;;  %s757_s21 = sphi %s809_s21, %s893_s21  }
   0x3   : > { %p31_p0 = scmp.ge.s32.totalorder %s29_s25, 2  ;;  %p615_p1 = scmp.ge.s32.totalorder %s765_s23, 1 }
   0x4   : > { %p195_p2 = scmp.lt.s32.totalorder %s765_s23, 3  ;;  %p834_p4 = scmp.eq.s32.totalorder %s613_s24, 0 }
   0x5   : > { %s896_s25 = smov (%p31_p0, %s29_s25), 0  ;;  %s767_s28 = smov [#allocation2]  }
   0x6   : > { %p830_p3 = pnand %p615_p1, %p195_p2  ;;  %s219_s29 = sshll.u32 %s767_s28, 4  ;;  %s220_s29 = int_to_ptr.vmem [resolvable:$true] %s219_s29 }
   0x7   : > { %s724_s30 = scalar_lea.vmem %s220_s29, 4096  ;;  %p732_p11 = scmp.lt.s32.totalorder %s220_s29, %s220_s29 }
   0x8   : > { %p674_p5 = pneg %p830_p3  ;;  %p725_p8 = scmp.ne.s32.totalorder %s220_s29, %s724_s30 }
   0x9   : > { %p733_p12 = scmp.lt.s32.totalorder %s724_s30, %s724_s30 }
   0xa   : > { %p675_p6 = pnand %p834_p4, %p674_p5 }
   0xb   : > { %p734_p13 = por %p733_p12, %p732_p11 }
   0xc   : > { %p715_p7 = pneg %p675_p6 }
   0xe   : > { %p727_p9 = pnand %p725_p8, %p715_p7 }
  0x10   : > { %p728_p10 = pneg %p727_p9 }
  0x12   : > { %p735_p0 = pnand %p734_p13, %p728_p10 }
  0x14   : > { %738 = shalt.err (!%p735_p0)
}
  0x15   : > { %s768_s7 = smov 128   ;;  %s769_s8 = smov 8  }
  0x16   : > { %677 = dma.hbm_to_vmem [thread:$0]  (!%p675_p6), %s889_s5, 4096, %s220_s29, [#allocation3], %s768_s7, %s768_s7, %s769_s8  }
  0x17   : > { %248 = sbr.rel (%p830_p3) target bundleno = 562 (0x232), region = 44 }
  0x1c   : > { %752 = dma.done.wait (%p834_p4), [#allocation3], 4096  }
  0x1d   : > { %754 = vsyncadd (%p834_p4), [#allocation3], 4294963200  ;;  %v770_v0 = vmov 0   ;;  %v302_v1 = vld [vmem:[%s885_s1] sm:$0xf]  ;;  %v362_v2 = vld [vmem:[#allocation2 + $0xf8] sm:$0xff]  ;;  %v310_v37 = vlaneseq }
  0x1e   : > { %711 = vset.pattern.permute.xlu0 %v770_v0  ;;  %712 = vset.pattern.permute.xlu1 %v770_v0  ;;  %v346_v3 = vld [vmem:[#allocation2 + $0x78] sm:$0xff]  ;;  %v361_v4 = vld [vmem:[#allocation2 + $0xf0] sm:$0xff]  ;;  %v316_v6 = vld [vmem:[%s886_s2] sm:$0xf]  ;;  %p285_p1 = scmp.lt.s32.totalorder %s757_s21, 1  ;;  %v772_v50 = vmov 0.0  }
  0x1f   : > { %305 = vperm.xlu0 %711, %v302_v1   ;;  %628 = vmatprep.subr.mxu0 %v362_v2  ;;  %v345_v5 = vld [vmem:[#allocation2 + $0x70] sm:$0xff]  ;;  %v360_v7 = vld [vmem:[#allocation2 + $0xe8] sm:$0xff]  ;;  %v359_v9 = vld [vmem:[#allocation2 + $0xe0] sm:$0xff]  ;;  %v771_v35 = vmov 839922192   ;;  %v311_v39 = vshrl.u32 %v310_v37, 7 }
  0x20   : > { %629 = vmatpush3.msra.mxu0 %v346_v3  ;;  %v344_v8 = vld [vmem:[#allocation2 + $0x68] sm:$0xff]  ;;  %v343_v10 = vld [vmem:[#allocation2 + $0x60] sm:$0xff]  ;;  %v358_v11 = vld [vmem:[#allocation2 + $0xd8] sm:$0xff]  ;;  %v308_v36 = vunpack.c.l.s4 %v771_v35  ;;  %s898_s21 = smov (!%p285_p1, %s757_s21), 1  ;;  %665 = vmatprep.subr.mxu1 %v772_v50  ;;  %vm773_vm0 = vmmov 0   ;;  %vm447_vm1 = vcmask 1043456  }
  0x21   : > { %630 = vmatprep.subr.mxu0 %v361_v4  ;;  %v342_v12 = vld [vmem:[#allocation2 + $0x58] sm:$0xff]  ;;  %v357_v13 = vld [vmem:[#allocation2 + $0xd0] sm:$0xff]  ;;  %v356_v15 = vld [vmem:[#allocation2 + $0xc8] sm:$0xff]  ;;  %s627_s15 = sshll.u32 %s898_s21, 3  ;;  %667 = vmatprep.mubr.msk.f32.mxu1 %vm773_vm0, %v772_v50  ;;  %vm443_vm2 = vcmask 31744   ;;  %s622_s27 = sshll.u32 %s898_s21, 1 }
  0x22   : > { %631 = vmatpush3.msra.mxu0 %v345_v5  ;;  %v341_v14 = vld [vmem:[#allocation2 + $0x50] sm:$0xff]  ;;  %v340_v16 = vld [vmem:[#allocation2 + $0x48] sm:$0xff]  ;;  %v355_v17 = vld [vmem:[#allocation2 + $0xc0] sm:$0xff]  ;;  %v309_v38 = vunpack.c.0.s8 %v308_v36  ;;  %s292_s18 = scalar_lea.vmem %s884_s0, %s627_s15  ;;  %s300_s30 = scalar_lea.vmem %s890_s6, %s622_s27  ;;  %vm521_vm3 = vcmask 517120  }
  0x23   : > { %319 = vperm.xlu0 %711, %v316_v6   ;;  %632 = vmatprep.subr.mxu0 %v360_v7  ;;  %v339_v18 = vld [vmem:[#allocation2 + $0x40] sm:$0xff]  ;;  %v354_v19 = vld [vmem:[#allocation2 + $0xb8] sm:$0xff]  ;;  %v353_v21 = vld [vmem:[#allocation2 + $0xb0] sm:$0xff] }
  0x24   : > { %633 = vmatpush3.msra.mxu0 %v344_v8  ;;  %v338_v20 = vld [vmem:[#allocation2 + $0x38] sm:$0xff]  ;;  %v337_v22 = vld [vmem:[#allocation2 + $0x30] sm:$0xff]  ;;  %v352_v23 = vld [vmem:[#allocation2 + $0xa8] sm:$0xff]  ;;  %v312_v40 = vsub.s32 %v309_v38, %v311_v39 }
  0x25   : > { %634 = vmatprep.subr.mxu0 %v359_v9  ;;  %v336_v24 = vld [vmem:[#allocation2 + $0x28] sm:$0xff]  ;;  %v351_v25 = vld [vmem:[#allocation2 + $0xa0] sm:$0xff]  ;;  %v350_v27 = vld [vmem:[#allocation2 + $0x98] sm:$0xff] }
  0x26   : > { %635 = vmatpush3.msra.mxu0 %v343_v10  ;;  %v335_v26 = vld [vmem:[#allocation2 + $0x20] sm:$0xff]  ;;  %v334_v28 = vld [vmem:[#allocation2 + $0x18] sm:$0xff]  ;;  %v349_v29 = vld [vmem:[#allocation2 + $0x90] sm:$0xff] }
  0x27   : > { %636 = vmatprep.subr.mxu0 %v358_v11  ;;  %v333_v30 = vld [vmem:[#allocation2 + $0x10] sm:$0xff]  ;;  %v348_v31 = vld [vmem:[#allocation2 + $0x88] sm:$0xff]  ;;  %v347_v33 = vld [vmem:[#allocation2 + $0x80] sm:$0xff] }
  0x28   : > { %637 = vmatpush3.msra.mxu0 %v342_v12  ;;  %v332_v32 = vld [vmem:[#allocation2 + $0x8] sm:$0xff]  ;;  %v331_v34 = vld [vmem:[#allocation2] sm:$0xff] }
  0x29   : > { %638 = vmatprep.subr.mxu0 %v357_v13  ;;  %v301_v43 = vld [vmem:[%s292_s18] sm:$0xff] }
  0x2a   : > { %639 = vmatpush3.msra.mxu0 %v341_v14  ;;  %v437_v51 = vld [vmem:[%s888_s4] sm:$0x3] }
  0x2b   : > { %640 = vmatprep.subr.mxu0 %v356_v15  ;;  %440 = vperm.xlu1 %712, %v437_v51   ;;  %v436_v55 = vld [vmem:[%s887_s3] sm:$0x3] }
  0x2c   : > { %641 = vmatpush3.msra.mxu0 %v340_v16 }
  0x2d   : > { %642 = vmatprep.subr.mxu0 %v355_v17 }
  0x2e   : > { %643 = vmatpush3.msra.mxu0 %v339_v18 }
  0x2f   : > { %644 = vmatprep.subr.mxu0 %v354_v19 }
  0x30   : > { %645 = vmatpush3.msra.mxu0 %v338_v20 }
  0x31   : > { %646 = vmatprep.subr.mxu0 %v353_v21 }
  0x32   : > { %647 = vmatpush3.msra.mxu0 %v337_v22 }
  0x33   : > { %648 = vmatprep.subr.mxu0 %v352_v23 }
  0x34   : > { %649 = vmatpush3.msra.mxu0 %v336_v24 }
  0x35   : > { %650 = vmatprep.subr.mxu0 %v351_v25 }
  0x36   : > { %651 = vmatpush3.msra.mxu0 %v335_v26 }
  0x37   : > { %652 = vmatprep.subr.mxu0 %v350_v27 }
  0x38   : > { %653 = vmatpush3.msra.mxu0 %v334_v28 }
  0x39   : > { %654 = vmatprep.subr.mxu0 %v349_v29 }
  0x3a   : > { %655 = vmatpush3.msra.mxu0 %v333_v30 }
  0x3b   : > { %656 = vmatprep.subr.mxu0 %v348_v31 }
  0x3c   : > { %657 = vmatpush3.msra.mxu0 %v332_v32 }
  0x3d   : > { %658 = vmatprep.subr.mxu0 %v347_v33 }
  0x3e   : > { %659 = vmatpush3.msra.mxu0 %v331_v34 }
  0x9a   : > { %v306_v41 = vpop.permute.xlu0 %305 }
  0x9b   : > { %v313_v42 = vrot.slane %v306_v41, %v312_v40 }
  0x9d   : > { %v315_v45 = vmul.f32 %v313_v42, %v301_v43 }
  0x9e   : > { %v320_v44 = vpop.permute.xlu0 %319 }
  0x9f   : > { %v327_v46 = vrot.slane %v320_v44, %v312_v40 }
  0xa1   : > { %v329_v47 = vadd.f32 %v327_v46, %v315_v45 }
  0xa3   : > { %v330_v48 = vmax.f32 %v329_v47, 0.0 }
  0xa5   : > { %v364_v49 = vcombine.high %v330_v48, %v330_v48 }
  0xa6   : > { %v441_v56 = vpop.permute.xlu1 %440 }
  0xa7   : > { %430 = vmatprep.mubr.f32.mxu0 %v364_v49 }
  0xa8   : > { %431 = vmatmul.mubr.f32.vlgmr.msra.gmra.mxu0 %v330_v48 }
 0x168   : > { %v660_v52 = vpop.f32.mrf.mxu0 }
 0x16a   : > { %v661_v53 = vpop.f32.mrf.mxu0 }
 0x16b   : > { %v662_v54 = vadd.f32 %v661_v53, %v660_v52 }
 0x16d   : > { %666 = vmatpush3.msk.msra.mxu1 %vm447_vm1, %v662_v54 }
 0x16e   : > { %668 = vmatmul.mubr.msk.f32.vlgmr.msra.gmra.mxu1 %vm443_vm2, %v436_v55 }
 0x22e   : > { %v517_v57 = vpop.f32.mrf.mxu1 }
 0x22f   : > { %v518_v58 = vadd.f32 %v517_v57, %v441_v56 }
 0x230   : > { %v669_v59 = vpop.f32.mrf.mxu1 }
 0x231   : > { %522 = vst.msk [vmem:[%s300_s30] sm:$0x3] %vm521_vm3, %v518_v58 }
 0x232 PF: > { %s17_s23 = sadd.s32 1, %s765_s23   ;;  %s893_s21 = smov %s761_s22 }
 0x233   : > { %p14_p2 = scmp.ge.s32.totalorder %s17_s23, 4   ;;  %s894_s22 = smov %s896_s25 }
 0x235   :  { %16 = sbr.rel (!%p14_p2) target bundleno = 2 (0x2), region = 79 }
 0x23a   :  { %548 = vsyncpa [#allocation3], 1 }
 0x23b   :  { %550 = vsyncpa [#allocation3 + $0x1], 1 }

</bundles_post_ra>
